<compile_context>
chip_gen: v7x
topology: tpu7x:2x2x1
jax: 0.10.0
libtpu: 0.0.40
codegen_flags: <defaults>
</compile_context>

<pallas_src>
import functools

import jax
import jax.numpy as jnp
from jax.experimental import pallas as pl
from jax.experimental.pallas import tpu as pltpu

EPS = 1e-5  # nn.InstanceNorm2d default eps


def _deconv_instnorm_kernel(xw_ref, w_ref, gb_ref, o_ref, *, K, W_out, P):
    # xw_ref: (1, Cin*K, Hp*W_out)  W-shifted input slab for one sample
    # w_ref:  (K, Cout, Cin*K)      per-kh weight matrices (pre-flipped)
    # gb_ref: (2, Cout, 1)          [gamma; beta]
    # o_ref:  (1, Cout, P)          normalized output, P = H_out*W_out on lanes
    #
    # kh handled by K accumulating MXU matmuls over contiguous lane slices
    # (kh is a static Python int -> static slices, no dynamic-slice machinery).
    acc = jnp.dot(w_ref[0], xw_ref[0, :, 0:P], preferred_element_type=jnp.float32)
    for kh in range(1, K):  # static unroll (K is tiny)
        rhs = xw_ref[0, :, kh * W_out: kh * W_out + P]            # (Cin*K, P)
        acc = acc + jnp.dot(w_ref[kh], rhs, preferred_element_type=jnp.float32)

    # Fused single-sweep instance norm (biased variance, PyTorch semantics).
    # The convT bias is omitted: a per-channel constant cancels exactly under
    # the mean subtraction.
    inv_p = jnp.float32(1.0 / P)
    mean = jnp.sum(acc, axis=1, keepdims=True) * inv_p            # (Cout, 1)
    ex2 = jnp.sum(acc * acc, axis=1, keepdims=True) * inv_p       # (Cout, 1)
    var = ex2 - mean * mean
    s = gb_ref[0] * jax.lax.rsqrt(var + EPS)                      # (Cout, 1)
    t = gb_ref[1] - mean * s                                      # (Cout, 1)
    o_ref[0] = (acc * s + t).astype(o_ref.dtype)


def deconv_forward(x, w, b, gamma, beta, *, stride, out_padding):
    """x: (N, Cin, H, W) NCHW.  w: (Cin, Cout, K, K) (ConvTranspose2d layout).

    `b` (ConvTranspose2d bias) is accepted for interface parity but unused:
    InstanceNorm subtracts the per-(sample, channel) mean, so a per-channel
    constant bias cancels exactly (exact simplification, not an approximation).
    """
    del b
    N, Cin, H, W = x.shape
    _, Cout, K, _ = w.shape
    padding = K // 2  # module convention; TODO(synk): revisit for even K
    H_out = (H - 1) * stride - 2 * padding + K + out_padding
    W_out = (W - 1) * stride - 2 * padding + K + out_padding

    # conv-transpose == stride-1 conv of the dilated, padded input with the
    # flipped kernel.
    pb = K - 1 - padding
    pa = K - 1 - padding + out_padding
    Hd = (H - 1) * stride + 1
    Wd = (W - 1) * stride + 1
    Hp = Hd + pb + pa                      # == H_out + K - 1
    Wp = Wd + pb + pa                      # == W_out + K - 1

    xp = jnp.zeros((N, Cin, Hp, Wp), x.dtype)
    xp = xp.at[:, :, pb:pb + Hd:stride, pb:pb + Wd:stride].set(x)

    # Partial (W-direction only) im2col:
    #   xw[n, ic*K + kw, h*W_out + ow] = xp[n, ic, h, ow + kw]
    # The kh shifts are contiguous lane slices of this slab, taken in-kernel.
    xw = jnp.stack([xp[:, :, :, kw:kw + W_out] for kw in range(K)], axis=2)
    xw = xw.reshape(N, Cin * K, Hp * W_out)

    # Per-kh weight matrices matching the stride-1 conv formulation:
    #   wk[kh, co, ic*K + kw] = w[ic, co, K-1-kh, K-1-kw]
    w_flip = jnp.flip(w, axis=(2, 3))                        # (Cin, Cout, K, K)
    wk = w_flip.transpose(2, 1, 0, 3).reshape(K, Cout, Cin * K)

    # gamma / beta packed into a single resident slab.
    gb = jnp.stack([gamma, beta], axis=0).reshape(2, Cout, 1)

    P = H_out * W_out
    kernel = functools.partial(_deconv_instnorm_kernel, K=K, W_out=W_out, P=P)

    out = pl.pallas_call(
        kernel,
        out_shape=jax.ShapeDtypeStruct((N, Cout, P), x.dtype),
        grid=(N,),
        in_specs=[
            pl.BlockSpec((1, Cin * K, Hp * W_out), lambda n: (n, 0, 0)),  # per-sample slab
            pl.BlockSpec((K, Cout, Cin * K), lambda n: (0, 0, 0)),        # weights (resident)
            pl.BlockSpec((2, Cout, 1), lambda n: (0, 0, 0)),              # gamma/beta (resident)
        ],
        out_specs=pl.BlockSpec((1, Cout, P), lambda n: (n, 0, 0)),
        compiler_params=pltpu.CompilerParams(dimension_semantics=("parallel",)),
    )(xw, wk, gb)

    # (N, Cout, P) -> NCHW is a pure reshape (no transpose, no extra HBM pass).
    return out.reshape(N, Cout, H_out, W_out)


def _reference(x, w, b, gamma, beta, *, stride, out_padding):
    """Pure-JAX reference of ConvTranspose2d + InstanceNorm2d (PyTorch semantics)."""
    K = w.shape[2]
    padding = K // 2
    pb = K - 1 - padding
    pa = K - 1 - padding + out_padding
    w_conv = jnp.flip(w, axis=(2, 3)).transpose(1, 0, 2, 3)  # -> OIHW
    y = jax.lax.conv_general_dilated(
        x, w_conv,
        window_strides=(1, 1),
        padding=[(pb, pa), (pb, pa)],
        lhs_dilation=(stride, stride),
        dimension_numbers=("NCHW", "OIHW", "NCHW"),
    ) + b[None, :, None, None]
    mean = y.mean(axis=(2, 3), keepdims=True)
    var = ((y - mean) ** 2).mean(axis=(2, 3), keepdims=True)
    y_hat = (y - mean) / jnp.sqrt(var + EPS)
    return y_hat * gamma[None, :, None, None] + beta[None, :, None, None]


if __name__ == "__main__":
    # Module config: DeConv(in_ch=4, out_ch=8, kernel_size=3, stride=2, out_padding=1)
    N, Cin, H, W = 2, 4, 16, 16
    Cout, K, stride, out_padding = 8, 3, 2, 1

    key = jax.random.PRNGKey(0)
    kx, kw, kb, kg, kbeta = jax.random.split(key, 5)
    x = jax.random.normal(kx, (N, Cin, H, W), dtype=jnp.float32)
    w = jax.random.normal(kw, (Cin, Cout, K, K), dtype=jnp.float32) * 0.1
    b = jax.random.normal(kb, (Cout,), dtype=jnp.float32) * 0.1
    gamma = 1.0 + 0.1 * jax.random.normal(kg, (Cout,), dtype=jnp.float32)
    beta = 0.1 * jax.random.normal(kbeta, (Cout,), dtype=jnp.float32)

    fwd = jax.jit(functools.partial(deconv_forward, stride=stride, out_padding=out_padding))
    out = fwd(x, w, b, gamma, beta)
    jax.block_until_ready(out)

    ref = _reference(x, w, b, gamma, beta, stride=stride, out_padding=out_padding)
    H_out = (H - 1) * stride - 2 * (K // 2) + K + out_padding
    W_out = (W - 1) * stride - 2 * (K // 2) + K + out_padding
    assert out.shape == (N, Cout, H_out, W_out)
    assert jnp.allclose(out, ref, rtol=1e-4, atol=1e-4), float(jnp.max(jnp.abs(out - ref)))
    print("KERNEL_OK")
</pallas_src>

<mosaic_0001>
module attributes {stable_mosaic.version = 11 : i64} {
  func.func @_deconv_instnorm_kernel(%arg0: i32, %arg1: memref<1x12x1088xf32, #tpu.memory_space<vmem>>, %arg2: memref<3x8x12xf32, #tpu.memory_space<vmem>>, %arg3: memref<2x8x1xf32, #tpu.memory_space<vmem>>, %arg4: memref<1x8x1024xf32, #tpu.memory_space<vmem>>) attributes {dimension_semantics = [#tpu.dimension_semantics<parallel>], iteration_bounds = array<i64: 2>, scalar_prefetch = 0 : i64, scratch_operands = 0 : i64, tpu.core_type = #tpu.core_type<tc>, window_params = [{transform_indices = @transform_0, window_bounds = array<i64: 1, 12, 1088>}, {pipeline_mode = #tpu.pipeline_mode<synchronous>, transform_indices = @transform_1, window_bounds = array<i64: 3, 8, 12>}, {pipeline_mode = #tpu.pipeline_mode<synchronous>, transform_indices = @transform_2, window_bounds = array<i64: 2, 8, 1>}, {transform_indices = @transform_3, window_bounds = array<i64: 1, 8, 1024>}]} {
    %c0 = arith.constant 0 : index
    %c0_0 = arith.constant 0 : index
    %c0_1 = arith.constant 0 : index
    %0 = vector.load %arg2[%c0, %c0_0, %c0_1] : memref<3x8x12xf32, #tpu.memory_space<vmem>>, vector<1x8x12xf32>
    %1 = vector.shape_cast %0 : vector<1x8x12xf32> to vector<8x12xf32>
    %c0_2 = arith.constant 0 : index
    %c0_3 = arith.constant 0 : index
    %c0_4 = arith.constant 0 : index
    %2 = vector.load %arg1[%c0_2, %c0_3, %c0_4] : memref<1x12x1088xf32, #tpu.memory_space<vmem>>, vector<1x12x1024xf32>
    %3 = vector.shape_cast %2 : vector<1x12x1024xf32> to vector<12x1024xf32>
    %cst = arith.constant dense<0.000000e+00> : vector<8x1024xf32>
    %4 = tpu.matmul %1, %3, %cst {dimension_numbers = #tpu.dot_dimension_numbers<[1], [0], [0], [1], [0, 0, 1, 1], [], []>} : vector<8x12xf32>, vector<12x1024xf32>, vector<8x1024xf32> -> vector<8x1024xf32>
    %c0_5 = arith.constant 0 : index
    %c0_6 = arith.constant 0 : index
    %c32 = arith.constant 32 : index
    %5 = vector.load %arg1[%c0_5, %c0_6, %c32] : memref<1x12x1088xf32, #tpu.memory_space<vmem>>, vector<1x12x1024xf32>
    %6 = vector.shape_cast %5 : vector<1x12x1024xf32> to vector<12x1024xf32>
    %c1 = arith.constant 1 : index
    %c0_7 = arith.constant 0 : index
    %c0_8 = arith.constant 0 : index
    %7 = vector.load %arg2[%c1, %c0_7, %c0_8] : memref<3x8x12xf32, #tpu.memory_space<vmem>>, vector<1x8x12xf32>
    %8 = vector.shape_cast %7 : vector<1x8x12xf32> to vector<8x12xf32>
    %cst_9 = arith.constant dense<0.000000e+00> : vector<8x1024xf32>
    %9 = tpu.matmul %8, %6, %cst_9 {dimension_numbers = #tpu.dot_dimension_numbers<[1], [0], [0], [1], [0, 0, 1, 1], [], []>} : vector<8x12xf32>, vector<12x1024xf32>, vector<8x1024xf32> -> vector<8x1024xf32>
    %10 = arith.addf %4, %9 : vector<8x1024xf32>
    %c0_10 = arith.constant 0 : index
    %c0_11 = arith.constant 0 : index
    %c64 = arith.constant 64 : index
    %11 = vector.load %arg1[%c0_10, %c0_11, %c64] : memref<1x12x1088xf32, #tpu.memory_space<vmem>>, vector<1x12x1024xf32>
    %12 = vector.shape_cast %11 : vector<1x12x1024xf32> to vector<12x1024xf32>
    %c2 = arith.constant 2 : index
    %c0_12 = arith.constant 0 : index
    %c0_13 = arith.constant 0 : index
    %13 = vector.load %arg2[%c2, %c0_12, %c0_13] : memref<3x8x12xf32, #tpu.memory_space<vmem>>, vector<1x8x12xf32>
    %14 = vector.shape_cast %13 : vector<1x8x12xf32> to vector<8x12xf32>
    %cst_14 = arith.constant dense<0.000000e+00> : vector<8x1024xf32>
    %15 = tpu.matmul %14, %12, %cst_14 {dimension_numbers = #tpu.dot_dimension_numbers<[1], [0], [0], [1], [0, 0, 1, 1], [], []>} : vector<8x12xf32>, vector<12x1024xf32>, vector<8x1024xf32> -> vector<8x1024xf32>
    %16 = arith.addf %10, %15 : vector<8x1024xf32>
    %cst_15 = arith.constant dense<0.000000e+00> : vector<8xf32>
    %17 = vector.multi_reduction <add>, %16, %cst_15 [1] : vector<8x1024xf32> to vector<8xf32>
    %18 = vector.shape_cast %17 : vector<8xf32> to vector<8x1xf32>
    %cst_16 = arith.constant 9.765625E-4 : f32
    %19 = vector.broadcast %cst_16 : f32 to vector<8x1xf32>
    %20 = arith.mulf %18, %19 : vector<8x1xf32>
    %21 = arith.mulf %16, %16 : vector<8x1024xf32>
    %cst_17 = arith.constant dense<0.000000e+00> : vector<8xf32>
    %22 = vector.multi_reduction <add>, %21, %cst_17 [1] : vector<8x1024xf32> to vector<8xf32>
    %23 = vector.shape_cast %22 : vector<8xf32> to vector<8x1xf32>
    %cst_18 = arith.constant 9.765625E-4 : f32
    %24 = vector.broadcast %cst_18 : f32 to vector<8x1xf32>
    %25 = arith.mulf %23, %24 : vector<8x1xf32>
    %26 = arith.mulf %20, %20 : vector<8x1xf32>
    %27 = arith.subf %25, %26 : vector<8x1xf32>
    %c0_19 = arith.constant 0 : index
    %c0_20 = arith.constant 0 : index
    %c0_21 = arith.constant 0 : index
    %28 = vector.load %arg3[%c0_19, %c0_20, %c0_21] : memref<2x8x1xf32, #tpu.memory_space<vmem>>, vector<1x8x1xf32>
    %29 = vector.shape_cast %28 : vector<1x8x1xf32> to vector<8x1xf32>
    %cst_22 = arith.constant 9.99999974E-6 : f32
    %30 = vector.broadcast %cst_22 : f32 to vector<8x1xf32>
    %31 = arith.addf %27, %30 : vector<8x1xf32>
    %32 = math.rsqrt %31 : vector<8x1xf32>
    %33 = arith.mulf %29, %32 : vector<8x1xf32>
    %c1_23 = arith.constant 1 : index
    %c0_24 = arith.constant 0 : index
    %c0_25 = arith.constant 0 : index
    %34 = vector.load %arg3[%c1_23, %c0_24, %c0_25] : memref<2x8x1xf32, #tpu.memory_space<vmem>>, vector<1x8x1xf32>
    %35 = vector.shape_cast %34 : vector<1x8x1xf32> to vector<8x1xf32>
    %36 = arith.mulf %20, %33 : vector<8x1xf32>
    %37 = arith.subf %35, %36 : vector<8x1xf32>
    %38 = vector.broadcast %33 : vector<8x1xf32> to vector<8x1024xf32>
    %39 = arith.mulf %16, %38 : vector<8x1024xf32>
    %40 = vector.broadcast %37 : vector<8x1xf32> to vector<8x1024xf32>
    %41 = arith.addf %39, %40 : vector<8x1024xf32>
    %c0_26 = arith.constant 0 : index
    %c0_27 = arith.constant 0 : index
    %c0_28 = arith.constant 0 : index
    %42 = vector.load %arg4[%c0_26, %c0_27, %c0_28] : memref<1x8x1024xf32, #tpu.memory_space<vmem>>, vector<1x8x1024xf32>
    %43 = vector.shape_cast %42 : vector<1x8x1024xf32> to vector<8x1024xf32>
    %44 = vector.shape_cast %41 : vector<8x1024xf32> to vector<1x8x1024xf32>
    tpu.vector_store %arg4[%c0_26, %c0_27, %c0_28], %44 {strides = array<i32>} : memref<1x8x1024xf32, #tpu.memory_space<vmem>>, vector<1x8x1024xf32>,
    return
  }
  func.func @transform_0(%arg0: i32) -> (i32, i32, i32) {
    %c0_i32 = arith.constant 0 : i32
    %c0_i32_0 = arith.constant 0 : i32
    %c0_i32_1 = arith.constant 0 : i32
    return %arg0, %c0_i32, %c0_i32_0 : i32, i32, i32
  }
  func.func @transform_1(%arg0: i32) -> (i32, i32, i32) {
    %c0_i32 = arith.constant 0 : i32
    %c0_i32_0 = arith.constant 0 : i32
    %c0_i32_1 = arith.constant 0 : i32
    %c0_i32_2 = arith.constant 0 : i32
    return %c0_i32, %c0_i32_0, %c0_i32_1 : i32, i32, i32
  }
  func.func @transform_2(%arg0: i32) -> (i32, i32, i32) {
    %c0_i32 = arith.constant 0 : i32
    %c0_i32_0 = arith.constant 0 : i32
    %c0_i32_1 = arith.constant 0 : i32
    %c0_i32_2 = arith.constant 0 : i32
    return %c0_i32, %c0_i32_0, %c0_i32_1 : i32, i32, i32
  }
  func.func @transform_3(%arg0: i32) -> (i32, i32, i32) {
    %c0_i32 = arith.constant 0 : i32
    %c0_i32_0 = arith.constant 0 : i32
    %c0_i32_1 = arith.constant 0 : i32
    return %arg0, %c0_i32, %c0_i32_0 : i32, i32, i32
  }
}

</mosaic_0001>

<bundles_post_ra>
// kernel: deconv_forward.1
= control target key start
LH: loop header
LB: loop body
LE: loop exit
PB: predicated region body
PF: predicated region fallthrough
CT: control target
= control target key end

     0   :  { %s1659_s12 = smov 0   ;;  %s1920_s0 = inlined_call_operand.vmem [shape: f32[2,12,1088], index: 0, kind: input, shape index: {}]   ;;  %s1921_s1 = inlined_call_operand.vmem [shape: f32[3,8,12], index: 1, kind: input, shape index: {}]   ;;  %s1922_s2 = inlined_call_operand.vmem [shape: f32[2,8,1], index: 2, kind: input, shape index: {}]   ;;  %s1923_s3 = inlined_call_operand.vmem [shape: f32[2,8,1024], index: 3, kind: output, shape index: {}]  }
   0x1 LB: > { %s1380_s13 = sadd.s32 4294967295, %s1632_s12   ;;  %p1384_p0 = scmp.ge.s32.totalorder %s1632_s12, 1  ;;  %s1632_s12 = sphi %s1659_s12, %s13_s12  }
   0x2   : > { %p137_p1 = scmp.lt.s32.totalorder %s1632_s12, 3 }
   0x4   : > { %p138_p2 = pnand %p1384_p0, %p137_p1 }
   0x5   : > { %p161_p3 = scmp.lt.s32.totalorder (!%p138_p2), %s1380_s13, 1  ;;  %s1634_s18 = smov (!%p138_p2), 96   ;;  %v1635_v25 = vmov (!%p138_p2), 0.0   ;;  %vm246_vm0 = vcmask (!%p138_p2), 785408   ;;  %vm275_vm1 = vcmask (!%p138_p2), 1043456   ;;  %vm1637_vm2 = vmmov (!%p138_p2), 1  }
   0x6   : > { %141 = sbr.rel (%p138_p2) target bundleno = 697 (0x2b9), region = 32  ;;  %356 = vmatprep.mubr.f32.mxu0 (!%p138_p2), %v1635_v25  ;;  %427 = vmatprep.mubr.f32.mxu1 (!%p138_p2), %v1635_v25  ;;  %s1636_s19 = smov (!%p138_p2), 64   ;;  %vm1770_vm3 = vmpackc.low (!%p138_p2), %vm275_vm1, %vm1637_vm2  ;;  %vm271_vm4 = vcmask (!%p138_p2), 97280   ;;  %vm917_vm5 = vcmask (!%p138_p2), 523264  }
   0xd   : > { %s1927_s13 = smov (!%p161_p3, %s1380_s13), 1 }
   0xe   : > { %s1518_s14 = smul.u32 144, %s1927_s13  ;;  %s1429_s30 = sshll.u32 %s1927_s13, 6 }
   0xf   : > { %s170_s6 = scalar_lea.vmem %s1923_s3, %s1429_s30 }
  0x10   : > { %s1673_s17 = scalar_lea.vmem %s1920_s0, %s1518_s14 }
  0x11   : > { %v1676_v0 = vld [vmem:[%s1673_s17 + $0x8] sm:$0xff]  ;;  %v1679_v1 = vld [vmem:[%s1673_s17 + $0x10] sm:$0xff]  ;;  %v1685_v3 = vld [vmem:[%s1673_s17 + $0x58] sm:$0xf] }
  0x12   : > { %v1682_v2 = vld [vmem:[%s1673_s17 + $0x50] sm:$0xf]  ;;  %v1532_v4 = vpack.i.bf16 %v1679_v1, %v1676_v0  ;;  %v1692_v6 = vld [vmem:[%s1673_s17] sm:$0xff]  ;;  %v1695_v7 = vld [vmem:[%s1673_s17 + $0x48] sm:$0xf]  ;;  %v1463_v8 = vpack.c.bf16 %v1685_v3, %v1679_v1 }
  0x13   : > { %v1454_v5 = vpack.c.bf16 %v1682_v2, %v1676_v0  ;;  %v1542_v9 = vpack.i.bf16 %v1695_v7, %v1692_v6  ;;  %v1457_v10 = vpack.c.bf16 %v1695_v7, %v1692_v6  ;;  %v1704_v11 = vld [vmem:[%s1673_s17 + $0x18] sm:$0xff]  ;;  %v1707_v12 = vld [vmem:[%s1673_s17 + $0x20] sm:$0xff]  ;;  %v1537_v13 = vpack.i.bf16 %v1685_v3, %v1682_v2  ;;  %v1713_v14 = vld [vmem:[%s1673_s17 + $0x68] sm:$0xf] }
  0x14   : > { %1533 = vrot.lane.b32.xlu0 %v1532_v4, %s1634_s18  ;;  %v1547_v15 = vpack.i.bf16 %v1707_v12, %v1704_v11  ;;  %v1719_v16 = vld [vmem:[%s1673_s17 + $0x60] sm:$0xf]  ;;  %v1469_v17 = vpack.c.bf16 %v1713_v14, %v1707_v12  ;;  %v1724_v18 = vld [vmem:[%s1673_s17 + $0x30] sm:$0xff]  ;;  %v1727_v19 = vld [vmem:[%s1673_s17 + $0x78] sm:$0xf] }
  0x15   : > { %1543 = vrot.lane.b32.xlu1 %v1542_v9, %s1634_s18  ;;  %v1730_v20 = vld [vmem:[%s1673_s17 + $0x28] sm:$0xff]  ;;  %v1475_v21 = vpack.c.bf16 %v1727_v19, %v1724_v18  ;;  %v1552_v22 = vpack.i.bf16 %v1713_v14, %v1719_v16  ;;  %v1741_v24 = vld [vmem:[%s1673_s17 + $0x70] sm:$0xf]  ;;  %v1745_v26 = vld [vmem:[%s1673_s17 + $0x38] sm:$0xff]  ;;  %v1460_v32 = vpack.c.bf16 %v1719_v16, %v1704_v11 }
  0x16   : > { %v1557_v23 = vpack.i.bf16 %v1724_v18, %v1730_v20  ;;  %v188_v27 = vld [vmem:[%s1673_s17 + $0x40] sm:$0xff]  ;;  %v1562_v28 = vpack.i.bf16 %v1727_v19, %v1741_v24  ;;  %v189_v31 = vld [vmem:[%s1673_s17 + $0x88] sm:$0xf]  ;;  %v1466_v33 = vpack.c.bf16 %v1741_v24, %v1730_v20 }
  0x17   : > { %v1567_v29 = vpack.i.bf16 %v188_v27, %v1745_v26  ;;  %v1755_v30 = vld [vmem:[%s1673_s17 + $0x80] sm:$0xf] }
  0x18   : > { %1538 = vrot.lane.b32.xlu0 %v1537_v13, %s1634_s18  ;;  %v1572_v34 = vpack.i.bf16 %v189_v31, %v1755_v30  ;;  %v1472_v35 = vpack.c.bf16 %v1755_v30, %v1745_v26  ;;  %v171_v0 = vld [vmem:[%s1921_s1] sm:$0xff]  ;;  %v1413_v26 = vld [vmem:[%s1921_s1 + $0x10] sm:$0xff] }
  0x19   : > { %1548 = vrot.lane.b32.xlu1 %v1547_v15, %s1634_s18 }
  0x1c   : > { %1553 = vrot.lane.b32.xlu0 %v1552_v22, %s1634_s18 }
  0x1d   : > { %1558 = vrot.lane.b32.xlu1 %v1557_v23, %s1634_s18 }
  0x20   : > { %1563 = vrot.lane.b32.xlu0 %v1562_v28, %s1634_s18 }
  0x21   : > { %1568 = vrot.lane.b32.xlu1 %v1567_v29, %s1634_s18 }
  0x24   : > { %1573 = vrot.lane.b32.xlu0 %v1572_v34, %s1634_s18 }
  0x25   : > { %1578 = vrot.lane.b32.xlu1 %v1532_v4, %s1636_s19 }
  0x28   : > { %1583 = vrot.lane.b32.xlu0 %v1537_v13, %s1636_s19 }
  0x29   : > { %1588 = vrot.lane.b32.xlu1 %v1542_v9, %s1636_s19  ;;  %v1388_v9 = vld [vmem:[%s1921_s1 + $0x8] sm:$0xff] }
  0x2c   : > { %1593 = vrot.lane.b32.xlu0 %v1547_v15, %s1636_s19 }
  0x2d   : > { %1598 = vrot.lane.b32.xlu1 %v1552_v22, %s1636_s19 }
  0x30   : > { %1603 = vrot.lane.b32.xlu0 %v1557_v23, %s1636_s19 }
  0x31   : > { %1608 = vrot.lane.b32.xlu1 %v1562_v28, %s1636_s19 }
  0x34   : > { %1613 = vrot.lane.b32.xlu0 %v1567_v29, %s1636_s19 }
  0x35   : > { %1618 = vrot.lane.b32.xlu1 %v1572_v34, %s1636_s19 }
  0x86   : > { %v1534_v36 = vpop.permute.xlu0 %1533 }
  0x87   : > { %v1544_v37 = vpop.permute.xlu1 %1543  ;;  %v1536_v38 = vunpack.i.h.bf16 %v1534_v36  ;;  %v1535_v39 = vunpack.i.l.bf16 %v1534_v36 }
  0x88   : > { %v1546_v40 = vunpack.i.h.bf16 %v1544_v37  ;;  %v1545_v41 = vunpack.i.l.bf16 %v1544_v37 }
  0x89   : > { %v248_v47 = vsel %vm246_vm0, %v1535_v39, %v1536_v38 }
  0x8a   : > { %v1539_v42 = vpop.permute.xlu0 %1538  ;;  %v247_v51 = vsel %vm246_vm0, %v1545_v41, %v1535_v39 }
  0x8b   : > { %v1541_v43 = vunpack.i.h.bf16 %v1539_v42  ;;  %v1540_v44 = vunpack.i.l.bf16 %v1539_v42  ;;  %v1549_v45 = vpop.permute.xlu1 %1548 }
  0x8c   : > { %v1551_v46 = vunpack.i.h.bf16 %v1549_v45  ;;  %v1550_v48 = vunpack.i.l.bf16 %v1549_v45 }
  0x8d   : > { %v256_v49 = vsel %vm246_vm0, %v1540_v44, %v1541_v43  ;;  %v255_v52 = vsel %vm246_vm0, %v1546_v40, %v1540_v44 }
  0x8e   : > { %v1554_v53 = vpop.permute.xlu0 %1553  ;;  %v1430_v54 = vpack.c.bf16 %v256_v49, %v248_v47  ;;  %v1433_v55 = vpack.c.bf16 %v255_v52, %v247_v51  ;;  %v250_v59 = vsel %vm246_vm0, %v1550_v48, %v1551_v46  ;;  %v249_v63 = vsel %vm246_vm0, %v1536_v38, %v1550_v48 }
  0x8f   : > { %v1556_v56 = vunpack.i.h.bf16 %v1554_v53  ;;  %v1555_v57 = vunpack.i.l.bf16 %v1554_v53  ;;  %v1559_v58 = vpop.permute.xlu1 %1558 }
  0x90   : > { %v1561_v60 = vunpack.i.h.bf16 %v1559_v58  ;;  %1432 = vmatprep.subr.msk.bf16.mxu0 %vm1770_vm3, %v1430_v54  ;;  %v1560_v61 = vunpack.i.l.bf16 %v1559_v58 }
  0x91   : > { %1435 = vmatpush1.bf16.msk.msra.mxu0 %vm1770_vm3, %v1433_v55  ;;  %v258_v62 = vsel %vm246_vm0, %v1555_v57, %v1556_v56  ;;  %v257_v4 = vsel %vm246_vm0, %v1541_v43, %v1555_v57 }
  0x92   : > { %v1564_v13 = vpop.permute.xlu0 %1563  ;;  %v1436_v15 = vpack.c.bf16 %v258_v62, %v250_v59  ;;  %v1439_v22 = vpack.c.bf16 %v257_v4, %v249_v63  ;;  %v252_v23 = vsel %vm246_vm0, %v1560_v61, %v1561_v60  ;;  %v251_v36 = vsel %vm246_vm0, %v1551_v46, %v1560_v61 }
  0x93   : > { %v1566_v27 = vunpack.i.h.bf16 %v1564_v13  ;;  %v1565_v28 = vunpack.i.l.bf16 %v1564_v13  ;;  %v1569_v29 = vpop.permute.xlu1 %1568 }
  0x94   : > { %v1571_v31 = vunpack.i.h.bf16 %v1569_v29  ;;  %v1570_v34 = vunpack.i.l.bf16 %v1569_v29  ;;  %1438 = vmatprep.subr.msk.bf16.mxu1 %vm1770_vm3, %v1436_v15  ;;  %1391 = vmatmul.mubr.msk.f32.vlgmr.msra.gmra.mrb[0].mxu0 %vm271_vm4, %v1388_v9 }
  0x95   : > { %v259_v37 = vsel %vm246_vm0, %v1556_v56, %v1565_v28  ;;  %v260_v38 = vsel %vm246_vm0, %v1565_v28, %v1566_v27  ;;  %1441 = vmatpush1.bf16.msk.msra.mxu1 %vm1770_vm3, %v1439_v22  ;;  %498 = vmatprep.mubr.f32.mxu0 %v1635_v25 }
  0x96   : > { %v1442_v39 = vpack.c.bf16 %v260_v38, %v252_v23  ;;  %v1445_v40 = vpack.c.bf16 %v259_v37, %v251_v36  ;;  %v1574_v41 = vpop.permute.xlu0 %1573  ;;  %v254_v42 = vsel %vm246_vm0, %v1570_v34, %v1571_v31  ;;  %v253_v47 = vsel %vm246_vm0, %v1561_v60, %v1570_v34 }
  0x97   : > { %v1576_v43 = vunpack.i.h.bf16 %v1574_v41  ;;  %v1575_v44 = vunpack.i.l.bf16 %v1574_v41  ;;  %v1579_v45 = vpop.permute.xlu1 %1578 }
  0x98   : > { %1444 = vmatprep.subr.msk.bf16.mxu0 %vm1770_vm3, %v1442_v39  ;;  %1394 = vmatmul.mubr.msk.f32.vlgmr.msra.gmra.mrb[0].mxu1 %vm271_vm4, %v1388_v9  ;;  %v1581_v49 = vunpack.i.h.bf16 %v1579_v45  ;;  %v1580_v51 = vunpack.i.l.bf16 %v1579_v45 }
  0x99   : > { %v261_v46 = vsel %vm246_vm0, %v1566_v27, %v1575_v44  ;;  %v262_v48 = vsel %vm246_vm0, %v1575_v44, %v1576_v43  ;;  %1447 = vmatpush1.bf16.msk.msra.mxu0 %vm1770_vm3, %v1445_v40  ;;  %569 = vmatprep.mubr.f32.mxu1 %v1635_v25 }
  0x9a   : > { %v1448_v52 = vpack.c.bf16 %v262_v48, %v254_v42  ;;  %v1451_v53 = vpack.c.bf16 %v261_v46, %v253_v47  ;;  %v1584_v54 = vpop.permute.xlu0 %1583  ;;  %1456 = vmatprep.subr.msk.bf16.mxu0 %vm1770_vm3, %v1454_v5  ;;  %v919_v60 = vsel %vm917_vm5, %v1580_v51, %v1581_v49 }
  0x9b   : > { %v1586_v55 = vunpack.i.h.bf16 %v1584_v54  ;;  %v1585_v56 = vunpack.i.l.bf16 %v1584_v54  ;;  %v1589_v57 = vpop.permute.xlu1 %1588 }
  0x9c   : > { %v1591_v58 = vunpack.i.h.bf16 %v1589_v57  ;;  %v1590_v59 = vunpack.i.l.bf16 %v1589_v57  ;;  %1397 = vmatmul.mubr.msk.f32.vlgmr.msra.gmra.mrb[2].mxu0 %vm271_vm4, %v1388_v9  ;;  %1450 = vmatprep.subr.msk.bf16.mxu1 %vm1770_vm3, %v1448_v52 }
  0x9d   : > { %v927_v61 = vsel %vm917_vm5, %v1585_v56, %v1586_v55  ;;  %1453 = vmatpush1.bf16.msk.msra.mxu1 %vm1770_vm3, %v1451_v53  ;;  %1459 = vmatpush1.bf16.msk.msra.mxu0 %vm1770_vm3, %v1457_v10 }
  0x9e   : > { %v1594_v2 = vpop.permute.xlu0 %1593  ;;  %659 = vmatprep.mubr.f32.mxu0 %v1635_v25  ;;  %1462 = vmatprep.subr.msk.bf16.mxu1 %vm1770_vm3, %v1460_v32  ;;  %v926_v5 = vsel %vm917_vm5, %v1591_v58, %v1585_v56  ;;  %v918_v6 = vsel %vm917_vm5, %v1590_v59, %v1580_v51  ;;  %v1478_v63 = vpack.c.bf16 %v927_v61, %v919_v60 }
  0x9f   : > { %v1596_v7 = vunpack.i.h.bf16 %v1594_v2  ;;  %v1595_v62 = vunpack.i.l.bf16 %v1594_v2  ;;  %v1599_v10 = vpop.permute.xlu1 %1598  ;;  %1468 = vmatprep.subr.msk.bf16.mxu0 %vm1770_vm3, %v1466_v33  ;;  %v1481_v16 = vpack.c.bf16 %v926_v5, %v918_v6 }
  0xa0   : > { %v1601_v4 = vunpack.i.h.bf16 %v1599_v10  ;;  %v1600_v13 = vunpack.i.l.bf16 %v1599_v10  ;;  %1400 = vmatmul.mubr.msk.f32.vlgmr.msra.gmra.mrb[2].mxu1 %vm271_vm4, %v1388_v9  ;;  %1403 = vmatmul.mubr.msk.f32.vlgmr.msra.gmra.mrb[0].mxu0 %vm271_vm4, %v171_v0 }
  0xa1   : > { %v921_v11 = vsel %vm917_vm5, %v1595_v62, %v1596_v7  ;;  %1465 = vmatpush1.bf16.msk.msra.mxu1 %vm1770_vm3, %v1463_v8  ;;  %1471 = vmatpush1.bf16.msk.msra.mxu0 %vm1770_vm3, %v1469_v17  ;;  %v920_v20 = vsel %vm917_vm5, %v1581_v49, %v1595_v62 }
  0xa2   : > { %v929_v24 = vsel %vm917_vm5, %v1600_v13, %v1601_v4  ;;  %v1604_v32 = vpop.permute.xlu0 %1603  ;;  %1480 = vmatprep.subr.msk.bf16.mxu0 %vm1770_vm3, %v1478_v63  ;;  %730 = vmatprep.mubr.f32.mxu1 %v1635_v25  ;;  %v928_v1 = vsel %vm917_vm5, %v1586_v55, %v1600_v13 }
  0xa3   : > { %v1484_v3 = vpack.c.bf16 %v929_v24, %v921_v11  ;;  %v1606_v8 = vunpack.i.h.bf16 %v1604_v32  ;;  %v1605_v33 = vunpack.i.l.bf16 %v1604_v32  ;;  %v1609_v12 = vpop.permute.xlu1 %1608  ;;  %801 = vmatprep.mubr.f32.mxu0 %v1635_v25  ;;  %1474 = vmatprep.subr.msk.bf16.mxu1 %vm1770_vm3, %v1472_v35  ;;  %v1487_v30 = vpack.c.bf16 %v928_v1, %v920_v20 }
  0xa4   : > { %v1611_v14 = vunpack.i.h.bf16 %v1609_v12  ;;  %v1610_v17 = vunpack.i.l.bf16 %v1609_v12  ;;  %1406 = vmatmul.mubr.msk.f32.vlgmr.msra.gmra.mrb[0].mxu1 %vm271_vm4, %v171_v0  ;;  %1409 = vmatmul.mubr.msk.f32.vlgmr.msra.gmra.mrb[2].mxu0 %vm271_vm4, %v171_v0  ;;  %v1426_v12 = vld [vmem:[%s1922_s2 + $0x8] sm:$0xff] }
  0xa5   : > { %v922_v9 = vsel %vm917_vm5, %v1596_v7, %v1605_v33  ;;  %v923_v15 = vsel %vm917_vm5, %v1605_v33, %v1606_v8  ;;  %1477 = vmatpush1.bf16.msk.msra.mxu1 %vm1770_vm3, %v1475_v21  ;;  %1483 = vmatpush1.bf16.msk.msra.mxu0 %vm1770_vm3, %v1481_v16 }
  0xa6   : > { %v930_v35 = vsel %vm917_vm5, %v1601_v4, %v1610_v17  ;;  %v931_v22 = vsel %vm917_vm5, %v1610_v17, %v1611_v14  ;;  %v1614_v23 = vpop.permute.xlu0 %1613  ;;  %872 = vmatprep.mubr.f32.mxu1 %v1635_v25  ;;  %1025 = vmatprep.mubr.f32.mxu0 %v1635_v25  ;;  %v1638_v4 = vmov 0  }
  0xa7   : > { %v1490_v18 = vpack.c.bf16 %v931_v22, %v923_v15  ;;  %v1493_v19 = vpack.c.bf16 %v930_v35, %v922_v9  ;;  %v1616_v21 = vunpack.i.h.bf16 %v1614_v23  ;;  %v1615_v27 = vunpack.i.l.bf16 %v1614_v23  ;;  %v1619_v28 = vpop.permute.xlu1 %1618  ;;  %1486 = vmatprep.subr.msk.bf16.mxu1 %vm1770_vm3, %v1484_v3  ;;  %1622 = vset.pattern.permute.xlu0 %v1638_v4  ;;  %v1283_v3 = vld [vmem:[%s1922_s2] sm:$0xff] }
  0xa8   : > { %v1621_v29 = vunpack.i.h.bf16 %v1619_v28  ;;  %v1620_v31 = vunpack.i.l.bf16 %v1619_v28  ;;  %1412 = vmatmul.mubr.msk.f32.vlgmr.msra.gmra.mrb[2].mxu1 %vm271_vm4, %v171_v0  ;;  %1416 = vmatmul.mubr.msk.f32.vlgmr.msra.gmra.mrb[0].mxu0 %vm271_vm4, %v1413_v26 }
  0xa9   : > { %v924_v34 = vsel %vm917_vm5, %v1606_v8, %v1615_v27  ;;  %v925_v36 = vsel %vm917_vm5, %v1615_v27, %v1616_v21  ;;  %1492 = vmatprep.subr.msk.bf16.mxu0 %vm1770_vm3, %v1490_v18  ;;  %1489 = vmatpush1.bf16.msk.msra.mxu1 %vm1770_vm3, %v1487_v30 }
  0xaa   : > { %v932_v37 = vsel %vm917_vm5, %v1611_v14, %v1620_v31  ;;  %v933_v38 = vsel %vm917_vm5, %v1620_v31, %v1621_v29  ;;  %1495 = vmatpush1.bf16.msk.msra.mxu0 %vm1770_vm3, %v1493_v19  ;;  %1096 = vmatprep.mubr.f32.mxu1 %v1635_v25 }
  0xab   : > { %v1496_v39 = vpack.c.bf16 %v933_v38, %v925_v36  ;;  %v1499_v40 = vpack.c.bf16 %v932_v37, %v924_v34  ;;  %1167 = vmatprep.mubr.f32.mxu0 %v1635_v25  ;;  %1623 = vset.pattern.permute.xlu1 %v1638_v4 }
  0xac   : > { %1419 = vmatmul.mubr.msk.f32.vlgmr.msra.gmra.mrb[0].mxu1 %vm271_vm4, %v1413_v26 }
  0xad   : > { %1422 = vmatmul.mubr.msk.f32.vlgmr.msra.gmra.mrb[2].mxu0 %vm271_vm4, %v1413_v26  ;;  %1498 = vmatprep.subr.msk.bf16.mxu1 %vm1770_vm3, %v1496_v39 }
  0xae   : > { %1501 = vmatpush1.bf16.msk.msra.mxu1 %vm1770_vm3, %v1499_v40  ;;  %1238 = vmatprep.mubr.f32.mxu1 %v1635_v25 }
  0xb1   : > { %1425 = vmatmul.mubr.msk.f32.vlgmr.msra.gmra.mrb[2].mxu1 %vm271_vm4, %v1413_v26 }
 0x17b   : > { %v1027_v41 = vpop.f32.mrb[0].mxu0 }
 0x17c   : > { %v1263_v42 = vmul.f32 %v1027_v41, %v1027_v41  ;;  %v1029_v43 = vpop.f32.mrb[1].mxu0 }
 0x17d   : > { %v1253_v44 = vadd.f32 %v1029_v43, %v1027_v41  ;;  %v1264_v45 = vmul.f32 %v1029_v43, %v1029_v43 }
 0x17f   : > { %v1271_v47 = vadd.f32 %v1264_v45, %v1263_v42  ;;  %v1098_v46 = vpop.f32.mrb[0].mxu1 }
 0x180   : > { %v1254_v48 = vadd.f32 %v1253_v44, %v1098_v46  ;;  %v1265_v49 = vmul.f32 %v1098_v46, %v1098_v46  ;;  %v1169_v51 = vpop.f32.mrb[2].mxu0  ;;  %v1100_v52 = vpop.f32.mrb[1].mxu1 }
 0x181   : > { %v1266_v53 = vmul.f32 %v1100_v52, %v1100_v52  ;;  %v1171_v54 = vpop.f32.mrb[3].mxu0  ;;  %v1267_v56 = vmul.f32 %v1169_v51, %v1169_v51 }
 0x182   : > { %v1272_v55 = vadd.f32 %v1271_v47, %v1265_v49  ;;  %v1255_v50 = vadd.f32 %v1254_v48, %v1100_v52  ;;  %v1268_v61 = vmul.f32 %v1171_v54, %v1171_v54 }
 0x184   : > { %v1273_v57 = vadd.f32 %v1272_v55, %v1266_v53  ;;  %v1256_v25 = vadd.f32 %v1255_v50, %v1169_v51  ;;  %v1240_v58 = vpop.f32.mrb[2].mxu1 }
 0x185   : > { %v1242_v59 = vpop.f32.mrb[3].mxu1  ;;  %v1269_v5 = vmul.f32 %v1240_v58, %v1240_v58 }
 0x186   : > { %v1257_v60 = vadd.f32 %v1256_v25, %v1171_v54  ;;  %v1274_v0 = vadd.f32 %v1273_v57, %v1267_v56  ;;  %v1270_v7 = vmul.f32 %v1242_v59, %v1242_v59 }
 0x188   : > { %v1275_v2 = vadd.f32 %v1274_v0, %v1268_v61  ;;  %v1258_v6 = vadd.f32 %v1257_v60, %v1240_v58 }
 0x18a   : > { %v1259_v62 = vadd.f32 %v1258_v6, %v1242_v59  ;;  %v1276_v10 = vadd.f32 %v1275_v2, %v1269_v5 }
 0x18c   : > { %1260 = vadd.xlane.f32.xlu0 %v1259_v62  ;;  %v1277_v63 = vadd.f32 %v1276_v10, %v1270_v7 }
 0x18e   : > { %1278 = vadd.xlane.f32.xlu1 %v1277_v63 }
 0x219   : > { %v1261_v13 = vpop.xlane.xlu0 %1260 }
 0x21a   : > { %v1262_v11 = vmul.f32 0.0009765625, %v1261_v13 }
 0x21b   : > { %v1279_v16 = vpop.xlane.xlu1 %1278 }
 0x21c   : > { %v1281_v20 = vmul.f32 %v1262_v11, %v1262_v11  ;;  %v1280_v24 = vmul.f32 0.0009765625, %v1279_v16 }
 0x21e   : > { %v1282_v32 = vsub.f32 %v1280_v24, %v1281_v20 }
 0x220   : > { %v1284_v1 = vadd.f32 1e-05, %v1282_v32 }
 0x222   : > { %1624 = vrsqrt.f32 %v1284_v1 }
 0x22c   : > { %v1625_v8 = vpop.eup %1624 }
 0x22d   : > { %v1286_v33 = vmul.f32 %v1625_v8, %v1283_v3 }
 0x22f   : > { %1293 = vperm.xlu0 %1622, %v1286_v33   ;;  %v1289_v14 = vmul.f32 %v1286_v33, %v1262_v11 }
 0x231   : > { %v1290_v17 = vsub.f32 %v1426_v12, %v1289_v14 }
 0x233   : > { %1306 = vperm.xlu1 %1623, %v1290_v17  }
 0x2ae   : > { %v1294_v9 = vpop.permute.xlu0 %1293 }
 0x2af   : > { %v1296_v15 = vmul.f32 %v1294_v9, %v1027_v41  ;;  %v1297_v26 = vmul.f32 %v1294_v9, %v1029_v43  ;;  %v1298_v30 = vmul.f32 %v1294_v9, %v1098_v46  ;;  %v1299_v35 = vmul.f32 %v1294_v9, %v1100_v52 }
 0x2b0   : > { %v1300_v22 = vmul.f32 %v1294_v9, %v1169_v51  ;;  %v1301_v23 = vmul.f32 %v1294_v9, %v1171_v54  ;;  %v1302_v18 = vmul.f32 %v1294_v9, %v1240_v58  ;;  %v1303_v19 = vmul.f32 %v1294_v9, %v1242_v59 }
 0x2b2   : > { %v1307_v21 = vpop.permute.xlu1 %1306 }
 0x2b3   : > { %v1309_v27 = vadd.f32 %v1307_v21, %v1296_v15  ;;  %v1310_v28 = vadd.f32 %v1307_v21, %v1297_v26  ;;  %v1311_v29 = vadd.f32 %v1307_v21, %v1298_v30  ;;  %v1312_v31 = vadd.f32 %v1307_v21, %v1299_v35 }
 0x2b4   : > { %v1313_v34 = vadd.f32 %v1307_v21, %v1300_v22  ;;  %v1314_v36 = vadd.f32 %v1307_v21, %v1301_v23  ;;  %v1315_v37 = vadd.f32 %v1307_v21, %v1302_v18  ;;  %v1316_v38 = vadd.f32 %v1307_v21, %v1303_v19 }
 0x2b5   : > { %1317 = vst [vmem:[%s170_s6] sm:$0xff] %v1309_v27  ;;  %1318 = vst [vmem:[%s170_s6 + $0x8] sm:$0xff] %v1310_v28 }
 0x2b6   : > { %1319 = vst [vmem:[%s170_s6 + $0x10] sm:$0xff] %v1311_v29  ;;  %1320 = vst [vmem:[%s170_s6 + $0x18] sm:$0xff] %v1312_v31 }
 0x2b7   : > { %1321 = vst [vmem:[%s170_s6 + $0x20] sm:$0xff] %v1313_v34  ;;  %1322 = vst [vmem:[%s170_s6 + $0x28] sm:$0xff] %v1314_v36 }
 0x2b8   : > { %1323 = vst [vmem:[%s170_s6 + $0x30] sm:$0xff] %v1315_v37  ;;  %1324 = vst [vmem:[%s170_s6 + $0x38] sm:$0xff] %v1316_v38 }
 0x2b9 PF: > { %s13_s12 = sadd.s32 1, %s1632_s12  }
 0x2ba   : > { %p10_p4 = scmp.ge.s32.totalorder %s13_s12, 4  }
 0x2bc   :  { %12 = sbr.rel (!%p10_p4) target bundleno = 1 (0x1), region = 65 }

</bundles_post_ra>
